<compile_context>
chip_gen: v6e
topology: v6e:2x2x1
jax: 0.10.0
libtpu: 0.0.40
codegen_flags: <defaults>
</compile_context>

<pallas_src>
import functools

import jax
import jax.numpy as jnp
from jax.experimental import pallas as pl
from jax.experimental.pallas import tpu as pltpu


def _round_up(x: int, m: int) -> int:
    return ((x + m - 1) // m) * m


def coupling_fwd_kernel(x1_ref, x2_ref, w1_ref, b1_ref,
                        ws2_ref, bs2_ref, wt2_ref, bt2_ref, out_ref):
    """Fused coupling-block forward for one batch tile.

    x1_ref : [TB, D1]   transformed channel (native width, no lane padding)
    x2_ref : [TB, D2]   conditioning channel
    w1_ref : [D2, 2H]   fused layer-1 weights [ws1 | wt1]
    b1_ref : [1, 2H]    fused layer-1 bias    [bs1 | bt1]
    ws2_ref: [H, D1]    scale-MLP layer-2 weight
    bs2_ref: [1, D1]    scale-MLP layer-2 bias
    wt2_ref: [H, D1]    translate-MLP layer-2 weight
    bt2_ref: [1, D1]    translate-MLP layer-2 bias
    out_ref: [TB, D1]   x1 * exp(s) + t
    """
    x2 = x2_ref[...]

    # Fused layer 1 for both MLPs: one lane-dense [*, 2H] matmul + tanh.
    h = jnp.tanh(
        jnp.dot(x2, w1_ref[...], preferred_element_type=jnp.float32) + b1_ref[...]
    )

    # Layer 2: two native-width dots (no block-diagonal zeros, no lane padding).
    h_dim = ws2_ref.shape[0]  # H
    s = jnp.dot(h[:, :h_dim], ws2_ref[...],
                preferred_element_type=jnp.float32) + bs2_ref[...]
    t = jnp.dot(h[:, h_dim:], wt2_ref[...],
                preferred_element_type=jnp.float32) + bt2_ref[...]

    # resize_data then translate_data (forward order).
    out_ref[...] = x1_ref[...] * jnp.exp(s) + t


def pack_params(params):
    """Pack raw MLP parameters ONCE at init (outside the jitted forward).

    Layer-1 weights/biases of the scale & translate MLPs are concatenated so
    the kernel runs a single lane-dense [D2, 2H] matmul; layer-2 stays as two
    small native-width weights (no block-diagonal zeros, no feature padding).
    """
    f32 = jnp.float32
    return {
        "w1": jnp.concatenate([params["ws1"], params["wt1"]], axis=1).astype(f32),
        "b1": jnp.concatenate([params["bs1"], params["bt1"]], axis=1).astype(f32),
        "ws2": params["ws2"].astype(f32),
        "bs2": params["bs2"].astype(f32),
        "wt2": params["wt2"].astype(f32),
        "bt2": params["bt2"].astype(f32),
    }


@functools.partial(jax.jit, static_argnames=("tile_b",))
def invertible_block_forward(x1, x2, packed, *, tile_b=None):
    """Coupling-block forward (parity=0, inverse=False).

    Returns (x1 * exp(s(x2)) + t(x2), x2 unchanged).
    """
    B, D1 = x1.shape
    _, D2 = x2.shape
    w1, b1 = packed["w1"], packed["b1"]
    ws2, bs2 = packed["ws2"], packed["bs2"]
    wt2, bt2 = packed["wt2"], packed["bt2"]
    H2 = w1.shape[1]
    H = H2 // 2

    # Batch tile: default = two balanced grid steps (both TCs on v7x), capped
    # at 1024 rows; always a multiple of 8 (sublane rule), even if user-given.
    if tile_b is None:
        tile_b = min(1024, -(-B // 2))
    TB = max(8, _round_up(min(tile_b, B), 8))
    Bp = _round_up(B, TB)

    x1p = x1.astype(jnp.float32)
    x2p = x2.astype(jnp.float32)
    if Bp != B:
        # Padded x2 rows give finite s/t (tanh/exp of biases), padded x1 rows
        # are 0, so padded outputs are finite and simply sliced off below.
        x1p = jnp.pad(x1p, ((0, Bp - B), (0, 0)))
        x2p = jnp.pad(x2p, ((0, Bp - B), (0, 0)))

    grid = (Bp // TB,)

    # Advisory cost hint for XLA scheduling around this us-scale custom call.
    flops = 2 * Bp * D2 * H2 + 2 * (2 * Bp * H * D1) + 3 * Bp * D1
    transcendentals = Bp * (H2 + D1)
    bytes_accessed = 4 * (Bp * (2 * D1 + D2) + D2 * H2 + H2 + 2 * (H * D1 + D1))

    out_p = pl.pallas_call(
        coupling_fwd_kernel,
        out_shape=jax.ShapeDtypeStruct((Bp, D1), jnp.float32),
        grid=grid,
        in_specs=[
            pl.BlockSpec((TB, D1), lambda i: (i, 0)),   # x1 tile (native width)
            pl.BlockSpec((TB, D2), lambda i: (i, 0)),   # x2 tile
            pl.BlockSpec((D2, H2), lambda i: (0, 0)),   # w1  (VMEM-resident)
            pl.BlockSpec((1, H2), lambda i: (0, 0)),    # b1  (resident)
            pl.BlockSpec((H, D1), lambda i: (0, 0)),    # ws2 (resident)
            pl.BlockSpec((1, D1), lambda i: (0, 0)),    # bs2 (resident)
            pl.BlockSpec((H, D1), lambda i: (0, 0)),    # wt2 (resident)
            pl.BlockSpec((1, D1), lambda i: (0, 0)),    # bt2 (resident)
        ],
        out_specs=pl.BlockSpec((TB, D1), lambda i: (i, 0)),
        compiler_params=pltpu.CompilerParams(
            # batch rows independent -> shard grid steps across v7x's 2 TCs
            dimension_semantics=("parallel",),
        ),
        cost_estimate=pl.CostEstimate(
            flops=flops,
            transcendentals=transcendentals,
            bytes_accessed=bytes_accessed,
        ),
    )(x1p, x2p, w1, b1, ws2, bs2, wt2, bt2)

    out = out_p if Bp == B else out_p[:B]
    return out, x2


def _reference_forward(x1, x2, p):
    """Pure-JAX reference of the same forward pass (for correctness check)."""
    s = jnp.tanh(x2 @ p["ws1"] + p["bs1"]) @ p["ws2"] + p["bs2"]
    t = jnp.tanh(x2 @ p["wt1"] + p["bt1"]) @ p["wt2"] + p["bt2"]
    return x1 * jnp.exp(s) + t


# TODO(synk): only the forward (inverse=False) direction of InvertibleBlock is
# implemented; the inverse path (reversed op order, subtract/negate) would be a
# second, analogous kernel.

if __name__ == "__main__":
    # Small shapes consistent with a fully-connected coupling block; B chosen
    # so the default tiling gives exactly two balanced grid steps.
    B, D1, D2, H = 512, 32, 32, 64

    key = jax.random.PRNGKey(0)
    k = jax.random.split(key, 10)

    scale = 0.1  # keep exp(s) well-conditioned
    params = {
        "ws1": scale * jax.random.normal(k[0], (D2, H), jnp.float32),
        "bs1": scale * jax.random.normal(k[1], (1, H), jnp.float32),
        "ws2": scale * jax.random.normal(k[2], (H, D1), jnp.float32),
        "bs2": scale * jax.random.normal(k[3], (1, D1), jnp.float32),
        "wt1": scale * jax.random.normal(k[4], (D2, H), jnp.float32),
        "bt1": scale * jax.random.normal(k[5], (1, H), jnp.float32),
        "wt2": scale * jax.random.normal(k[6], (H, D1), jnp.float32),
        "bt2": scale * jax.random.normal(k[7], (1, D1), jnp.float32),
    }

    x1 = jax.random.normal(k[8], (B, D1), jnp.float32)  # FIRST_CHANNEL (transformed)
    x2 = jax.random.normal(k[9], (B, D2), jnp.float32)  # SECOND_CHANNEL (conditioning)

    packed = pack_params(params)  # one-time packing, outside the hot path

    out1, out2 = invertible_block_forward(x1, x2, packed)
    out1 = jax.block_until_ready(out1)
    out2 = jax.block_until_ready(out2)

    ref = _reference_forward(x1, x2, params)
    assert jnp.allclose(out1, ref, atol=1e-5, rtol=1e-5), "kernel mismatch vs reference"
    assert jnp.array_equal(out2, x2), "conditioning channel must pass through unchanged"

    print("KERNEL_OK")
</pallas_src>

<mosaic_0001>
module attributes {stable_mosaic.version = 11 : i64} {
  func.func @coupling_fwd_kernel(%arg0: i32, %arg1: memref<256x32xf32, #tpu.memory_space<vmem>>, %arg2: memref<256x32xf32, #tpu.memory_space<vmem>>, %arg3: memref<32x128xf32, #tpu.memory_space<vmem>>, %arg4: memref<1x128xf32, #tpu.memory_space<vmem>>, %arg5: memref<64x32xf32, #tpu.memory_space<vmem>>, %arg6: memref<1x32xf32, #tpu.memory_space<vmem>>, %arg7: memref<64x32xf32, #tpu.memory_space<vmem>>, %arg8: memref<1x32xf32, #tpu.memory_space<vmem>>, %arg9: memref<256x32xf32, #tpu.memory_space<vmem>>) attributes {dimension_semantics = [#tpu.dimension_semantics<parallel>], iteration_bounds = array<i64: 2>, scalar_prefetch = 0 : i64, scratch_operands = 0 : i64, tpu.core_type = #tpu.core_type<tc>, window_params = [{transform_indices = @transform_0, window_bounds = array<i64: 256, 32>}, {transform_indices = @transform_1, window_bounds = array<i64: 256, 32>}, {pipeline_mode = #tpu.pipeline_mode<synchronous>, transform_indices = @transform_2, window_bounds = array<i64: 32, 128>}, {pipeline_mode = #tpu.pipeline_mode<synchronous>, transform_indices = @transform_3, window_bounds = array<i64: 1, 128>}, {pipeline_mode = #tpu.pipeline_mode<synchronous>, transform_indices = @transform_4, window_bounds = array<i64: 64, 32>}, {pipeline_mode = #tpu.pipeline_mode<synchronous>, transform_indices = @transform_5, window_bounds = array<i64: 1, 32>}, {pipeline_mode = #tpu.pipeline_mode<synchronous>, transform_indices = @transform_6, window_bounds = array<i64: 64, 32>}, {pipeline_mode = #tpu.pipeline_mode<synchronous>, transform_indices = @transform_7, window_bounds = array<i64: 1, 32>}, {transform_indices = @transform_8, window_bounds = array<i64: 256, 32>}]} {
    %c0 = arith.constant 0 : index
    %c0_0 = arith.constant 0 : index
    %0 = vector.load %arg2[%c0, %c0_0] : memref<256x32xf32, #tpu.memory_space<vmem>>, vector<256x32xf32>
    %c0_1 = arith.constant 0 : index
    %c0_2 = arith.constant 0 : index
    %1 = vector.load %arg3[%c0_1, %c0_2] : memref<32x128xf32, #tpu.memory_space<vmem>>, vector<32x128xf32>
    %cst = arith.constant dense<0.000000e+00> : vector<256x128xf32>
    %2 = tpu.matmul %0, %1, %cst {dimension_numbers = #tpu.dot_dimension_numbers<[1], [0], [0], [1], [0, 0, 1, 1], [], []>} : vector<256x32xf32>, vector<32x128xf32>, vector<256x128xf32> -> vector<256x128xf32>
    %c0_3 = arith.constant 0 : index
    %c0_4 = arith.constant 0 : index
    %3 = vector.load %arg4[%c0_3, %c0_4] : memref<1x128xf32, #tpu.memory_space<vmem>>, vector<1x128xf32>
    %4 = vector.broadcast %3 : vector<1x128xf32> to vector<256x128xf32>
    %5 = arith.addf %2, %4 : vector<256x128xf32>
    %6 = math.tanh %5 : vector<256x128xf32>
    %7 = vector.extract_strided_slice %6 {offsets = [0, 0], sizes = [256, 64], strides = [1, 1]} : vector<256x128xf32> to vector<256x64xf32>
    %c0_5 = arith.constant 0 : index
    %c0_6 = arith.constant 0 : index
    %8 = vector.load %arg5[%c0_5, %c0_6] : memref<64x32xf32, #tpu.memory_space<vmem>>, vector<64x32xf32>
    %cst_7 = arith.constant dense<0.000000e+00> : vector<256x32xf32>
    %9 = tpu.matmul %7, %8, %cst_7 {dimension_numbers = #tpu.dot_dimension_numbers<[1], [0], [0], [1], [0, 0, 1, 1], [], []>} : vector<256x64xf32>, vector<64x32xf32>, vector<256x32xf32> -> vector<256x32xf32>
    %c0_8 = arith.constant 0 : index
    %c0_9 = arith.constant 0 : index
    %10 = vector.load %arg6[%c0_8, %c0_9] : memref<1x32xf32, #tpu.memory_space<vmem>>, vector<1x32xf32>
    %11 = vector.broadcast %10 : vector<1x32xf32> to vector<256x32xf32>
    %12 = arith.addf %9, %11 : vector<256x32xf32>
    %13 = vector.extract_strided_slice %6 {offsets = [0, 64], sizes = [256, 64], strides = [1, 1]} : vector<256x128xf32> to vector<256x64xf32>
    %c0_10 = arith.constant 0 : index
    %c0_11 = arith.constant 0 : index
    %14 = vector.load %arg7[%c0_10, %c0_11] : memref<64x32xf32, #tpu.memory_space<vmem>>, vector<64x32xf32>
    %cst_12 = arith.constant dense<0.000000e+00> : vector<256x32xf32>
    %15 = tpu.matmul %13, %14, %cst_12 {dimension_numbers = #tpu.dot_dimension_numbers<[1], [0], [0], [1], [0, 0, 1, 1], [], []>} : vector<256x64xf32>, vector<64x32xf32>, vector<256x32xf32> -> vector<256x32xf32>
    %c0_13 = arith.constant 0 : index
    %c0_14 = arith.constant 0 : index
    %16 = vector.load %arg8[%c0_13, %c0_14] : memref<1x32xf32, #tpu.memory_space<vmem>>, vector<1x32xf32>
    %17 = vector.broadcast %16 : vector<1x32xf32> to vector<256x32xf32>
    %18 = arith.addf %15, %17 : vector<256x32xf32>
    %c0_15 = arith.constant 0 : index
    %c0_16 = arith.constant 0 : index
    %19 = vector.load %arg1[%c0_15, %c0_16] : memref<256x32xf32, #tpu.memory_space<vmem>>, vector<256x32xf32>
    %20 = math.exp %12 : vector<256x32xf32>
    %21 = arith.mulf %19, %20 : vector<256x32xf32>
    %22 = arith.addf %21, %18 : vector<256x32xf32>
    %c0_17 = arith.constant 0 : index
    %c0_18 = arith.constant 0 : index
    %23 = vector.load %arg9[%c0_17, %c0_18] : memref<256x32xf32, #tpu.memory_space<vmem>>, vector<256x32xf32>
    tpu.vector_store %arg9[%c0_17, %c0_18], %22 {strides = array<i32>} : memref<256x32xf32, #tpu.memory_space<vmem>>, vector<256x32xf32>,
    return
  }
  func.func @transform_0(%arg0: i32) -> (i32, i32) {
    %c0_i32 = arith.constant 0 : i32
    %c0_i32_0 = arith.constant 0 : i32
    return %arg0, %c0_i32 : i32, i32
  }
  func.func @transform_1(%arg0: i32) -> (i32, i32) {
    %c0_i32 = arith.constant 0 : i32
    %c0_i32_0 = arith.constant 0 : i32
    return %arg0, %c0_i32 : i32, i32
  }
  func.func @transform_2(%arg0: i32) -> (i32, i32) {
    %c0_i32 = arith.constant 0 : i32
    %c0_i32_0 = arith.constant 0 : i32
    %c0_i32_1 = arith.constant 0 : i32
    return %c0_i32, %c0_i32_0 : i32, i32
  }
  func.func @transform_3(%arg0: i32) -> (i32, i32) {
    %c0_i32 = arith.constant 0 : i32
    %c0_i32_0 = arith.constant 0 : i32
    %c0_i32_1 = arith.constant 0 : i32
    return %c0_i32, %c0_i32_0 : i32, i32
  }
  func.func @transform_4(%arg0: i32) -> (i32, i32) {
    %c0_i32 = arith.constant 0 : i32
    %c0_i32_0 = arith.constant 0 : i32
    %c0_i32_1 = arith.constant 0 : i32
    return %c0_i32, %c0_i32_0 : i32, i32
  }
  func.func @transform_5(%arg0: i32) -> (i32, i32) {
    %c0_i32 = arith.constant 0 : i32
    %c0_i32_0 = arith.constant 0 : i32
    %c0_i32_1 = arith.constant 0 : i32
    return %c0_i32, %c0_i32_0 : i32, i32
  }
  func.func @transform_6(%arg0: i32) -> (i32, i32) {
    %c0_i32 = arith.constant 0 : i32
    %c0_i32_0 = arith.constant 0 : i32
    %c0_i32_1 = arith.constant 0 : i32
    return %c0_i32, %c0_i32_0 : i32, i32
  }
  func.func @transform_7(%arg0: i32) -> (i32, i32) {
    %c0_i32 = arith.constant 0 : i32
    %c0_i32_0 = arith.constant 0 : i32
    %c0_i32_1 = arith.constant 0 : i32
    return %c0_i32, %c0_i32_0 : i32, i32
  }
  func.func @transform_8(%arg0: i32) -> (i32, i32) {
    %c0_i32 = arith.constant 0 : i32
    %c0_i32_0 = arith.constant 0 : i32
    return %arg0, %c0_i32 : i32, i32
  }
}

</mosaic_0001>

<bundles_post_ra>
// kernel: invertible_block_forward.1
= control target key start
LH: loop header
LB: loop body
LE: loop exit
PB: predicated region body
PF: predicated region fallthrough
CT: control target
= control target key end

     0   :  { %s2304_s27 = smov 0   ;;  %s2822_s0 = inlined_call_operand.vmem [shape: f32[512,32], index: 0, kind: input, shape index: {}]   ;;  %s2823_s1 = inlined_call_operand.vmem [shape: f32[512,32], index: 1, kind: input, shape index: {}]   ;;  %s2824_s2 = inlined_call_operand.vmem [shape: f32[32,128], index: 2, kind: input, shape index: {}]   ;;  %s2825_s3 = inlined_call_operand.vmem [shape: f32[1,128], index: 3, kind: input, shape index: {}]   ;;  %s2826_s4 = inlined_call_operand.vmem [shape: f32[64,32], index: 4, kind: input, shape index: {}]   ;;  %s2827_s5 = inlined_call_operand.vmem [shape: f32[1,32], index: 5, kind: input, shape index: {}]   ;;  %s2828_s6 = inlined_call_operand.vmem [shape: f32[64,32], index: 6, kind: input, shape index: {}]   ;;  %s2829_s7 = inlined_call_operand.vmem [shape: f32[1,32], index: 7, kind: input, shape index: {}]   ;;  %s2830_s8 = inlined_call_operand.vmem [shape: f32[512,32], index: 8, kind: output, shape index: {}]  }
   0x1 LB: > { %s1693_s28 = sadd.s32 4294967295, %s2256_s27   ;;  %p1697_p0 = scmp.ge.s32.totalorder %s2256_s27, 1  ;;  %s2256_s27 = sphi %s2304_s27, %s18_s27  }
   0x2   : > { %p274_p1 = scmp.lt.s32.totalorder %s2256_s27, 3 }
   0x4   : > { %p275_p2 = pnand %p1697_p0, %p274_p1 }
   0x5   : > { %s1698_s11 = sshll.u32 (!%p275_p2), %s1693_s28, 5  ;;  %s2258_s13 = smov (!%p275_p2), 64  }
   0x6   : > { %278 = sbr.rel (%p275_p2) target bundleno = 610 (0x262), region = 52  ;;  %p314_p3 = scmp.lt.s32.totalorder (!%p275_p2), %s1698_s11, 63 }
   0xb   : > { %v366_v0 = vld [vmem:[%s2824_s2 + $0x18] sm:$0xff]  ;;  %v365_v1 = vld [vmem:[%s2824_s2 + $0x10] sm:$0xff]  ;;  %v364_v2 = vld [vmem:[%s2824_s2 + $0x8] sm:$0xff]  ;;  %s2832_s11 = smov (!%p314_p3, %s1698_s11), 63  ;;  %vm374_vm0 = vcmask 261120   ;;  %vm743_vm1 = vcmask 523264  }
   0xc   : > { %1921 = vmatprep.subr.mxu0 %v366_v0  ;;  %2105 = vmatprep.subr.mxu1 %v366_v0  ;;  %v363_v3 = vld [vmem:[%s2824_s2] sm:$0xff]  ;;  %s2324_s16 = sshll.u32 %s2832_s11, 3  ;;  %v735_v36 = vld [vmem:[%s2826_s4 + $0x38] sm:$0xff]  ;;  %v734_v37 = vld [vmem:[%s2826_s4 + $0x30] sm:$0xff] }
   0xd   : > { %1922 = vmatpush3.msra.mxu0 %v366_v0  ;;  %2109 = vmatpush3.msra.mxu1 %v366_v0  ;;  %s2330_s19 = scalar_lea.vmem %s2823_s1, %s2324_s16  ;;  %v733_v38 = vld [vmem:[%s2826_s4 + $0x28] sm:$0xff]  ;;  %v732_v39 = vld [vmem:[%s2826_s4 + $0x20] sm:$0xff]  ;;  %v731_v40 = vld [vmem:[%s2826_s4 + $0x18] sm:$0xff]  ;;  %s2656_s24 = scalar_lea.vmem %s2830_s8, %s2324_s16 }
   0xe   : > { %1923 = vmatprep.subr.mxu0 %v365_v1  ;;  %2106 = vmatprep.subr.mxu1 %v365_v1  ;;  %v331_v4 = vld [vmem:[%s2330_s19] sm:$0xff]  ;;  %v332_v5 = vld [vmem:[%s2330_s19 + $0x8] sm:$0xff]  ;;  %v333_v6 = vld [vmem:[%s2330_s19 + $0x10] sm:$0xff] }
   0xf   : > { %1924 = vmatpush3.msra.mxu0 %v365_v1  ;;  %2110 = vmatpush3.msra.mxu1 %v365_v1  ;;  %v334_v7 = vld [vmem:[%s2330_s19 + $0x18] sm:$0xff]  ;;  %v335_v8 = vld [vmem:[%s2330_s19 + $0x20] sm:$0xff]  ;;  %v348_v10 = vld [vmem:[%s2330_s19 + $0x88] sm:$0xff] }
  0x10   : > { %1925 = vmatprep.subr.mxu0 %v364_v2  ;;  %2107 = vmatprep.subr.mxu1 %v364_v2  ;;  %v347_v9 = vld [vmem:[%s2330_s19 + $0x80] sm:$0xff]  ;;  %v349_v11 = vld [vmem:[%s2330_s19 + $0x90] sm:$0xff]  ;;  %v336_v12 = vld [vmem:[%s2330_s19 + $0x28] sm:$0xff] }
  0x11   : > { %1926 = vmatpush3.msra.mxu0 %v364_v2  ;;  %2111 = vmatpush3.msra.mxu1 %v364_v2  ;;  %v337_v13 = vld [vmem:[%s2330_s19 + $0x30] sm:$0xff]  ;;  %v350_v14 = vld [vmem:[%s2330_s19 + $0x98] sm:$0xff]  ;;  %v351_v15 = vld [vmem:[%s2330_s19 + $0xa0] sm:$0xff] }
  0x12   : > { %1927 = vmatprep.subr.mxu0 %v363_v3  ;;  %2108 = vmatprep.subr.mxu1 %v363_v3  ;;  %v338_v16 = vld [vmem:[%s2330_s19 + $0x38] sm:$0xff]  ;;  %v339_v17 = vld [vmem:[%s2330_s19 + $0x40] sm:$0xff]  ;;  %v352_v18 = vld [vmem:[%s2330_s19 + $0xa8] sm:$0xff] }
  0x13   : > { %1928 = vmatpush3.msra.mxu0 %v363_v3  ;;  %1929 = vmatprep.mubr.msk.f32.mxu0 %vm374_vm0, %v331_v4  ;;  %v353_v19 = vld [vmem:[%s2330_s19 + $0xb0] sm:$0xff]  ;;  %v340_v20 = vld [vmem:[%s2330_s19 + $0x48] sm:$0xff]  ;;  %v354_v22 = vld [vmem:[%s2330_s19 + $0xb8] sm:$0xff] }
  0x14   : > { %1930 = vmatmul.mubr.msk.f32.vlgmr.msra.gmra.mxu0 %vm374_vm0, %v332_v5  ;;  %2112 = vmatpush3.msra.mxu1 %v363_v3  ;;  %v341_v21 = vld [vmem:[%s2330_s19 + $0x50] sm:$0xff]  ;;  %v355_v23 = vld [vmem:[%s2330_s19 + $0xc0] sm:$0xff]  ;;  %v342_v24 = vld [vmem:[%s2330_s19 + $0x58] sm:$0xff] }
  0x15   : > { %1932 = vmatprep.mubr.msk.f32.mxu0 %vm374_vm0, %v333_v6  ;;  %1953 = vmatprep.mubr.msk.f32.mxu1 %vm374_vm0, %v347_v9  ;;  %v343_v25 = vld [vmem:[%s2330_s19 + $0x60] sm:$0xff]  ;;  %v356_v26 = vld [vmem:[%s2330_s19 + $0xc8] sm:$0xff]  ;;  %v357_v27 = vld [vmem:[%s2330_s19 + $0xd0] sm:$0xff] }
  0x16   : > { %1954 = vmatmul.mubr.msk.f32.vlgmr.msra.gmra.mxu1 %vm374_vm0, %v348_v10  ;;  %v344_v28 = vld [vmem:[%s2330_s19 + $0x68] sm:$0xff]  ;;  %v345_v29 = vld [vmem:[%s2330_s19 + $0x70] sm:$0xff]  ;;  %v358_v30 = vld [vmem:[%s2330_s19 + $0xd8] sm:$0xff]  ;;  %1977 = vmatprep.subr.mxu1 %v735_v36 }
  0x17   : > { %1956 = vmatprep.mubr.msk.f32.mxu1 %vm374_vm0, %v349_v11  ;;  %v359_v31 = vld [vmem:[%s2330_s19 + $0xe0] sm:$0xff]  ;;  %v346_v32 = vld [vmem:[%s2330_s19 + $0x78] sm:$0xff]  ;;  %v360_v33 = vld [vmem:[%s2330_s19 + $0xe8] sm:$0xff]  ;;  %1978 = vmatpush3.msra.mxu1 %v735_v36 }
  0x18   : > { %1933 = vmatmul.mubr.msk.f32.gmra.mxu0 %vm374_vm0, %v334_v7  ;;  %v361_v34 = vld [vmem:[%s2330_s19 + $0xf0] sm:$0xff]  ;;  %v362_v35 = vld [vmem:[%s2330_s19 + $0xf8] sm:$0xff]  ;;  %1979 = vmatprep.subr.mxu1 %v734_v37  ;;  %v729_v42 = vld [vmem:[%s2826_s4 + $0x8] sm:$0xff]  ;;  %s2634_s19 = scalar_lea.vmem %s2822_s0, %s2324_s16 }
  0x19   : > { %1935 = vmatprep.mubr.msk.f32.mxu0 %vm374_vm0, %v335_v8  ;;  %1980 = vmatpush3.msra.mxu1 %v734_v37  ;;  %v730_v41 = vld [vmem:[%s2826_s4 + $0x10] sm:$0xff]  ;;  %v728_v43 = vld [vmem:[%s2826_s4] sm:$0xff]  ;;  %v1072_v44 = vld [vmem:[%s2828_s6 + $0x38] sm:$0xff] }
  0x1a   : > { %1957 = vmatmul.mubr.msk.f32.gmra.mxu1 %vm374_vm0, %v350_v14  ;;  %1981 = vmatprep.subr.mxu1 %v733_v38  ;;  %v1071_v45 = vld [vmem:[%s2828_s6 + $0x30] sm:$0xff]  ;;  %v1070_v46 = vld [vmem:[%s2828_s6 + $0x28] sm:$0xff]  ;;  %v1069_v47 = vld [vmem:[%s2828_s6 + $0x20] sm:$0xff] }
  0x1b   : > { %1959 = vmatprep.mubr.msk.f32.mxu1 %vm374_vm0, %v351_v15  ;;  %1982 = vmatpush3.msra.mxu1 %v733_v38  ;;  %v1068_v48 = vld [vmem:[%s2828_s6 + $0x18] sm:$0xff]  ;;  %v1067_v49 = vld [vmem:[%s2828_s6 + $0x10] sm:$0xff]  ;;  %v1066_v50 = vld [vmem:[%s2828_s6 + $0x8] sm:$0xff] }
  0x1c   : > { %1936 = vmatmul.mubr.msk.f32.gmra.mxu0 %vm374_vm0, %v336_v12  ;;  %1983 = vmatprep.subr.mxu1 %v732_v39  ;;  %v1065_v51 = vld [vmem:[%s2828_s6] sm:$0xff] }
  0x1d   : > { %1938 = vmatprep.mubr.msk.f32.mxu0 %vm374_vm0, %v337_v13  ;;  %1984 = vmatpush3.msra.mxu1 %v732_v39  ;;  %v2447_v52 = vld [vmem:[%s2825_s3] ss:$0 sm:$0xff] }
  0x1e   : > { %1960 = vmatmul.mubr.msk.f32.gmra.mxu1 %vm374_vm0, %v352_v18  ;;  %1985 = vmatprep.subr.mxu1 %v731_v40 }
  0x1f   : > { %1962 = vmatprep.mubr.msk.f32.mxu1 %vm374_vm0, %v353_v19  ;;  %1986 = vmatpush3.msra.mxu1 %v731_v40 }
  0x20   : > { %1939 = vmatmul.mubr.msk.f32.gmra.mxu0 %vm374_vm0, %v338_v16  ;;  %1987 = vmatprep.subr.mxu1 %v730_v41 }
  0x21   : > { %1941 = vmatprep.mubr.msk.f32.mxu0 %vm374_vm0, %v339_v17  ;;  %1988 = vmatpush3.msra.mxu1 %v730_v41 }
  0x22   : > { %1963 = vmatmul.mubr.msk.f32.gmra.mxu1 %vm374_vm0, %v354_v22  ;;  %1989 = vmatprep.subr.mxu1 %v729_v42 }
  0x23   : > { %1965 = vmatprep.mubr.msk.f32.mxu1 %vm374_vm0, %v355_v23  ;;  %1990 = vmatpush3.msra.mxu1 %v729_v42 }
  0x24   : > { %1942 = vmatmul.mubr.msk.f32.gmra.mxu0 %vm374_vm0, %v340_v20  ;;  %1991 = vmatprep.subr.mxu1 %v728_v43 }
  0x25   : > { %1944 = vmatprep.mubr.msk.f32.mxu0 %vm374_vm0, %v341_v21  ;;  %1992 = vmatpush3.msra.mxu1 %v728_v43 }
  0x26   : > { %1966 = vmatmul.mubr.msk.f32.gmra.mxu1 %vm374_vm0, %v356_v26  ;;  %2041 = vmatprep.subr.mxu0 %v1072_v44 }
  0x27   : > { %1968 = vmatprep.mubr.msk.f32.mxu1 %vm374_vm0, %v357_v27  ;;  %2042 = vmatpush3.msra.mxu0 %v1072_v44 }
  0x28   : > { %1945 = vmatmul.mubr.msk.f32.gmra.mxu0 %vm374_vm0, %v342_v24  ;;  %2043 = vmatprep.subr.mxu0 %v1071_v45 }
  0x29   : > { %1947 = vmatprep.mubr.msk.f32.mxu0 %vm374_vm0, %v343_v25  ;;  %2044 = vmatpush3.msra.mxu0 %v1071_v45 }
  0x2a   : > { %1969 = vmatmul.mubr.msk.f32.gmra.mxu1 %vm374_vm0, %v358_v30  ;;  %2045 = vmatprep.subr.mxu0 %v1070_v46 }
  0x2b   : > { %1971 = vmatprep.mubr.msk.f32.mxu1 %vm374_vm0, %v359_v31  ;;  %2046 = vmatpush3.msra.mxu0 %v1070_v46 }
  0x2c   : > { %1948 = vmatmul.mubr.msk.f32.gmra.mxu0 %vm374_vm0, %v344_v28  ;;  %2047 = vmatprep.subr.mxu0 %v1069_v47 }
  0x2d   : > { %1950 = vmatprep.mubr.msk.f32.mxu0 %vm374_vm0, %v345_v29  ;;  %2048 = vmatpush3.msra.mxu0 %v1069_v47 }
  0x2e   : > { %1972 = vmatmul.mubr.msk.f32.gmra.mxu1 %vm374_vm0, %v360_v33  ;;  %2049 = vmatprep.subr.mxu0 %v1068_v48 }
  0x2f   : > { %1974 = vmatprep.mubr.msk.f32.mxu1 %vm374_vm0, %v361_v34  ;;  %2050 = vmatpush3.msra.mxu0 %v1068_v48 }
  0x30   : > { %1951 = vmatmul.mubr.msk.f32.gmra.mxu0 %vm374_vm0, %v346_v32  ;;  %2051 = vmatprep.subr.mxu0 %v1067_v49 }
  0x31   : > { %2052 = vmatpush3.msra.mxu0 %v1067_v49 }
  0x32   : > { %1975 = vmatmul.mubr.msk.f32.gmra.mxu1 %vm374_vm0, %v362_v35  ;;  %2053 = vmatprep.subr.mxu0 %v1066_v50 }
  0x33   : > { %2054 = vmatpush3.msra.mxu0 %v1066_v50 }
  0x34   : > { %2055 = vmatprep.subr.mxu0 %v1065_v51 }
  0x35   : > { %2056 = vmatpush3.msra.mxu0 %v1065_v51 }
  0xd4   : > { %v1931_v53 = vpop.f32.mrf.mxu0 }
  0xd5   : > { %v543_v54 = vadd.f32 %v1931_v53, %v2447_v52 }
  0xd6   : > { %v537_v55 = vpop.f32.mrf.mxu0  ;;  %v2451_v58 = vpop.f32.mrf.mxu1 }
  0xd7   : > { %v538_v56 = vadd.f32 %v2447_v52, %v537_v55  ;;  %v623_v41 = vadd.f32 %v2451_v58, %v2447_v52 }
  0xd8   : > { %v1934_v57 = vpop.f32.mrf.mxu0  ;;  %v2455_v62 = vpop.f32.mrf.mxu1 }
  0xd9   : > { %2122 = vtanh.f32 %v538_v56  ;;  %v553_v60 = vadd.f32 %v1934_v57, %v2447_v52  ;;  %v618_v37 = vadd.f32 %v2447_v52, %v2455_v62 }
  0xda   : > { %2124 = vtanh.f32 %v543_v54  ;;  %v547_v59 = vpop.f32.mrf.mxu0  ;;  %v2458_v1 = vpop.f32.mrf.mxu1 }
  0xdb   : > { %v548_v61 = vadd.f32 %v2447_v52, %v547_v59  ;;  %v633_v46 = vadd.f32 %v2458_v1, %v2447_v52 }
  0xdc   : > { %v1937_v63 = vpop.f32.mrf.mxu0  ;;  %v2461_v4 = vpop.f32.mrf.mxu1 }
  0xdd   : > { %2126 = vtanh.f32 %v548_v61  ;;  %v563_v0 = vadd.f32 %v1937_v63, %v2447_v52  ;;  %v628_v43 = vadd.f32 %v2447_v52, %v2461_v4 }
  0xde   : > { %v557_v2 = vpop.f32.mrf.mxu0  ;;  %2128 = vtanh.f32 %v553_v60  ;;  %v2464_v7 = vpop.f32.mrf.mxu1 }
  0xdf   : > { %v558_v3 = vadd.f32 %v2447_v52, %v557_v2  ;;  %2130 = vtanh.f32 %v563_v0  ;;  %v643_v51 = vadd.f32 %v2464_v7, %v2447_v52 }
  0xe0   : > { %v1940_v5 = vpop.f32.mrf.mxu0  ;;  %v2467_v10 = vpop.f32.mrf.mxu1 }
  0xe1   : > { %2132 = vtanh.f32 %v558_v3  ;;  %v573_v6 = vadd.f32 %v1940_v5, %v2447_v52  ;;  %v638_v48 = vadd.f32 %v2447_v52, %v2467_v10 }
  0xe2   : > { %v567_v8 = vpop.f32.mrf.mxu0  ;;  %v2473_v17 = vpop.f32.mrf.mxu1 }
  0xe3   : > { %v568_v9 = vadd.f32 %v2447_v52, %v567_v8  ;;  %2134 = vtanh.f32 %v573_v6  ;;  %v653_v57 = vadd.f32 %v2473_v17, %v2447_v52 }
  0xe4   : > { %v1943_v11 = vpop.f32.mrf.mxu0  ;;  %v647_v23 = vpop.f32.mrf.mxu1 }
  0xe5   : > { %2136 = vtanh.f32 %v568_v9  ;;  %v583_v12 = vadd.f32 %v1943_v11, %v2447_v52  ;;  %v648_v54 = vadd.f32 %v2447_v52, %v647_v23 }
  0xe6   : > { %v2123_v13 = vpop.eup %2122  ;;  %v577_v14 = vpop.f32.mrf.mxu0 }
  0xe7   : > { %v2125_v15 = vpop.eup %2124  ;;  %v578_v16 = vadd.f32 %v2447_v52, %v577_v14  ;;  %1080 = vrot.lane.b32.xlu0 %v2123_v13, %s2258_s13  ;;  %1993 = vmatprep.mubr.msk.f32.mxu1 %vm743_vm1, %v2123_v13  ;;  %2138 = vtanh.f32 %v583_v12  ;;  %v2486_v31 = vpop.f32.mrf.mxu1 }
  0xe8   : > { %v1946_v18 = vpop.f32.mrf.mxu0  ;;  %1994 = vmatmul.mubr.msk.f32.vlgmr.msra.gmra.mxu1 %vm743_vm1, %v2125_v15  ;;  %v663_v62 = vadd.f32 %v2486_v31, %v2447_v52 }
  0xe9   : > { %2140 = vtanh.f32 %v578_v16  ;;  %v593_v19 = vadd.f32 %v1946_v18, %v2447_v52  ;;  %v657_v39 = vpop.f32.mrf.mxu1 }
  0xea   : > { %v2127_v20 = vpop.eup %2126  ;;  %v587_v21 = vpop.f32.mrf.mxu0  ;;  %v658_v59 = vadd.f32 %v2447_v52, %v657_v39 }
  0xeb   : > { %v588_v22 = vadd.f32 %v2447_v52, %v587_v21  ;;  %1084 = vrot.lane.b32.xlu1 %v2127_v20, %s2258_s13  ;;  %1082 = vrot.lane.b32.xlu0 %v2125_v15, %s2258_s13  ;;  %v2129_v24 = vpop.eup %2128  ;;  %2142 = vtanh.f32 %v593_v19  ;;  %v1970_v44 = vpop.f32.mrf.mxu1 }
  0xec   : > { %1996 = vmatprep.mubr.msk.f32.mxu1 %vm743_vm1, %v2127_v20  ;;  %v1949_v25 = vpop.f32.mrf.mxu0  ;;  %v2131_v26 = vpop.eup %2130  ;;  %v673_v3 = vadd.f32 %v1970_v44, %v2447_v52 }
  0xed   : > { %2144 = vtanh.f32 %v588_v22  ;;  %v603_v27 = vadd.f32 %v1949_v25, %v2447_v52  ;;  %1997 = vmatmul.mubr.msk.f32.gmra.mxu1 %vm743_vm1, %v2129_v24  ;;  %v667_v49 = vpop.f32.mrf.mxu1 }
  0xee   : > { %v2133_v28 = vpop.eup %2132  ;;  %v597_v29 = vpop.f32.mrf.mxu0  ;;  %v668_v0 = vadd.f32 %v2447_v52, %v667_v49 }
  0xef   : > { %v598_v30 = vadd.f32 %v2447_v52, %v597_v29  ;;  %1086 = vrot.lane.b32.xlu1 %v2129_v24, %s2258_s13  ;;  %1999 = vmatprep.mubr.msk.f32.mxu1 %vm743_vm1, %v2133_v28  ;;  %2146 = vtanh.f32 %v603_v27  ;;  %v1973_v55 = vpop.f32.mrf.mxu1 }
  0xf0   : > { %v1952_v32 = vpop.f32.mrf.mxu0  ;;  %1088 = vrot.lane.b32.xlu0 %v2133_v28, %s2258_s13  ;;  %v2135_v33 = vpop.eup %2134  ;;  %v683_v8 = vadd.f32 %v1973_v55, %v2447_v52 }
  0xf1   : > { %2148 = vtanh.f32 %v598_v30  ;;  %v613_v34 = vadd.f32 %v1952_v32, %v2447_v52  ;;  %2000 = vmatmul.mubr.msk.f32.gmra.mxu1 %vm743_vm1, %v2131_v26  ;;  %v677_v61 = vpop.f32.mrf.mxu1 }
  0xf2   : > { %v2137_v35 = vpop.eup %2136  ;;  %v607_v36 = vpop.f32.mrf.mxu0  ;;  %v678_v5 = vadd.f32 %v2447_v52, %v677_v61 }
  0xf3   : > { %v608_v38 = vadd.f32 %v2447_v52, %v607_v36  ;;  %1090 = vrot.lane.b32.xlu1 %v2131_v26, %s2258_s13  ;;  %2002 = vmatprep.mubr.msk.f32.mxu1 %vm743_vm1, %v2137_v35  ;;  %2150 = vtanh.f32 %v613_v34  ;;  %v1976_v2 = vpop.f32.mrf.mxu1 }
  0xf4   : > { %1092 = vrot.lane.b32.xlu0 %v2137_v35, %s2258_s13  ;;  %v2139_v40 = vpop.eup %2138  ;;  %v693_v12 = vadd.f32 %v1976_v2, %v2447_v52 }
  0xf5   : > { %2152 = vtanh.f32 %v608_v38  ;;  %2003 = vmatmul.mubr.msk.f32.gmra.mxu1 %vm743_vm1, %v2135_v33  ;;  %v687_v7 = vpop.f32.mrf.mxu1 }
  0xf6   : > { %v2141_v42 = vpop.eup %2140  ;;  %2154 = vtanh.f32 %v618_v37  ;;  %v688_v10 = vadd.f32 %v2447_v52, %v687_v7 }
  0xf7   : > { %1094 = vrot.lane.b32.xlu1 %v2135_v33, %s2258_s13  ;;  %2005 = vmatprep.mubr.msk.f32.mxu1 %vm743_vm1, %v2141_v42  ;;  %2156 = vtanh.f32 %v623_v41 }
  0xf8   : > { %1096 = vrot.lane.b32.xlu0 %v2141_v42, %s2258_s13  ;;  %v2143_v45 = vpop.eup %2142  ;;  %2158 = vtanh.f32 %v628_v43 }
  0xf9   : > { %2006 = vmatmul.mubr.msk.f32.gmra.mxu1 %vm743_vm1, %v2139_v40  ;;  %2160 = vtanh.f32 %v633_v46 }
  0xfa   : > { %v2145_v47 = vpop.eup %2144  ;;  %2162 = vtanh.f32 %v638_v48 }
  0xfb   : > { %1098 = vrot.lane.b32.xlu1 %v2139_v40, %s2258_s13  ;;  %2008 = vmatprep.mubr.msk.f32.mxu1 %vm743_vm1, %v2145_v47  ;;  %2164 = vtanh.f32 %v643_v51 }
  0xfc   : > { %1100 = vrot.lane.b32.xlu0 %v2145_v47, %s2258_s13  ;;  %v2147_v50 = vpop.eup %2146  ;;  %2166 = vtanh.f32 %v648_v54 }
  0xfd   : > { %2009 = vmatmul.mubr.msk.f32.gmra.mxu1 %vm743_vm1, %v2143_v45  ;;  %2168 = vtanh.f32 %v653_v57 }
  0xfe   : > { %v2149_v53 = vpop.eup %2148  ;;  %2170 = vtanh.f32 %v658_v59 }
  0xff   : > { %1102 = vrot.lane.b32.xlu1 %v2143_v45, %s2258_s13  ;;  %2011 = vmatprep.mubr.msk.f32.mxu1 %vm743_vm1, %v2149_v53  ;;  %2172 = vtanh.f32 %v663_v62 }
 0x100   : > { %1104 = vrot.lane.b32.xlu0 %v2149_v53, %s2258_s13  ;;  %v2151_v56 = vpop.eup %2150  ;;  %2174 = vtanh.f32 %v668_v0 }
 0x101   : > { %2012 = vmatmul.mubr.msk.f32.gmra.mxu1 %vm743_vm1, %v2147_v50  ;;  %2176 = vtanh.f32 %v673_v3 }
 0x102   : > { %v2153_v58 = vpop.eup %2152  ;;  %2178 = vtanh.f32 %v678_v5 }
 0x103   : > { %v2155_v60 = vpop.eup %2154  ;;  %1106 = vrot.lane.b32.xlu1 %v2147_v50, %s2258_s13  ;;  %2014 = vmatprep.mubr.msk.f32.mxu1 %vm743_vm1, %v2153_v58  ;;  %2180 = vtanh.f32 %v683_v8 }
 0x104   : > { %1108 = vrot.lane.b32.xlu0 %v2153_v58, %s2258_s13  ;;  %v2157_v63 = vpop.eup %2156  ;;  %2182 = vtanh.f32 %v688_v10 }
 0x105   : > { %2015 = vmatmul.mubr.msk.f32.gmra.mxu1 %vm743_vm1, %v2151_v56  ;;  %v2159_v1 = vpop.eup %2158  ;;  %2184 = vtanh.f32 %v693_v12 }
 0x106   : > { %2017 = vmatprep.mubr.msk.f32.mxu1 %vm743_vm1, %v2155_v60  ;;  %v2161_v4 = vpop.eup %2160 }
 0x107   : > { %1110 = vrot.lane.b32.xlu1 %v2151_v56, %s2258_s13  ;;  %v2163_v6 = vpop.eup %2162 }
 0x108   : > { %1112 = vrot.lane.b32.xlu0 %v2155_v60, %s2258_s13  ;;  %v2165_v9 = vpop.eup %2164 }
 0x109   : > { %2018 = vmatmul.mubr.msk.f32.gmra.mxu1 %vm743_vm1, %v2157_v63  ;;  %v2167_v11 = vpop.eup %2166 }
 0x10a   : > { %2020 = vmatprep.mubr.msk.f32.mxu1 %vm743_vm1, %v2159_v1  ;;  %v2169_v13 = vpop.eup %2168 }
 0x10b   : > { %1114 = vrot.lane.b32.xlu1 %v2157_v63, %s2258_s13  ;;  %v2171_v14 = vpop.eup %2170 }
 0x10c   : > { %1116 = vrot.lane.b32.xlu0 %v2159_v1, %s2258_s13  ;;  %v2173_v15 = vpop.eup %2172 }
 0x10d   : > { %2021 = vmatmul.mubr.msk.f32.gmra.mxu1 %vm743_vm1, %v2161_v4  ;;  %v2175_v16 = vpop.eup %2174 }
 0x10e   : > { %2023 = vmatprep.mubr.msk.f32.mxu1 %vm743_vm1, %v2163_v6  ;;  %v2177_v52 = vpop.eup %2176 }
 0x10f   : > { %1118 = vrot.lane.b32.xlu1 %v2161_v4, %s2258_s13  ;;  %v2179_v17 = vpop.eup %2178 }
 0x110   : > { %1120 = vrot.lane.b32.xlu0 %v2163_v6, %s2258_s13  ;;  %v2181_v18 = vpop.eup %2180  ;;  %v2608_v6 = vld [vmem:[%s2827_s5] ss:$0 sm:$0xff] }
 0x111   : > { %2024 = vmatmul.mubr.msk.f32.gmra.mxu1 %vm743_vm1, %v2165_v9  ;;  %v2183_v19 = vpop.eup %2182 }
 0x112   : > { %2026 = vmatprep.mubr.msk.f32.mxu1 %vm743_vm1, %v2167_v11  ;;  %v2185_v20 = vpop.eup %2184 }
 0x113   : > { %1122 = vrot.lane.b32.xlu1 %v2165_v9, %s2258_s13 }
 0x114   : > { %1124 = vrot.lane.b32.xlu0 %v2167_v11, %s2258_s13 }
 0x115   : > { %2027 = vmatmul.mubr.msk.f32.gmra.mxu1 %vm743_vm1, %v2169_v13 }
 0x116   : > { %2029 = vmatprep.mubr.msk.f32.mxu1 %vm743_vm1, %v2171_v14 }
 0x117   : > { %1126 = vrot.lane.b32.xlu1 %v2169_v13, %s2258_s13 }
 0x118   : > { %1128 = vrot.lane.b32.xlu0 %v2171_v14, %s2258_s13 }
 0x119   : > { %2030 = vmatmul.mubr.msk.f32.gmra.mxu1 %vm743_vm1, %v2173_v15 }
 0x11a   : > { %2032 = vmatprep.mubr.msk.f32.mxu1 %vm743_vm1, %v2175_v16 }
 0x11b   : > { %1130 = vrot.lane.b32.xlu1 %v2173_v15, %s2258_s13 }
 0x11c   : > { %1132 = vrot.lane.b32.xlu0 %v2175_v16, %s2258_s13 }
 0x11d   : > { %2033 = vmatmul.mubr.msk.f32.gmra.mxu1 %vm743_vm1, %v2177_v52 }
 0x11e   : > { %2035 = vmatprep.mubr.msk.f32.mxu1 %vm743_vm1, %v2179_v17 }
 0x11f   : > { %1134 = vrot.lane.b32.xlu1 %v2177_v52, %s2258_s13 }
 0x120   : > { %1136 = vrot.lane.b32.xlu0 %v2179_v17, %s2258_s13 }
 0x121   : > { %2036 = vmatmul.mubr.msk.f32.gmra.mxu1 %vm743_vm1, %v2181_v18 }
 0x122   : > { %2038 = vmatprep.mubr.msk.f32.mxu1 %vm743_vm1, %v2183_v19 }
 0x123   : > { %1138 = vrot.lane.b32.xlu1 %v2181_v18, %s2258_s13 }
 0x124   : > { %1140 = vrot.lane.b32.xlu0 %v2183_v19, %s2258_s13 }
 0x125   : > { %2039 = vmatmul.mubr.msk.f32.gmra.mxu1 %vm743_vm1, %v2185_v20 }
 0x127   : > { %1142 = vrot.lane.b32.xlu1 %v2185_v20, %s2258_s13 }
 0x159   : > { %v1081_v21 = vpop.permute.xlu0 %1080 }
 0x15a   : > { %2057 = vmatprep.mubr.msk.f32.mxu0 %vm743_vm1, %v1081_v21 }
 0x15d   : > { %v1085_v22 = vpop.permute.xlu1 %1084  ;;  %v1083_v23 = vpop.permute.xlu0 %1082 }
 0x15e   : > { %2058 = vmatmul.mubr.msk.f32.vlgmr.msra.gmra.mxu0 %vm743_vm1, %v1083_v23 }
 0x15f   : > { %2060 = vmatprep.mubr.msk.f32.mxu0 %vm743_vm1, %v1085_v22 }
 0x161   : > { %v1087_v24 = vpop.permute.xlu1 %1086 }
 0x162   : > { %2061 = vmatmul.mubr.msk.f32.gmra.mxu0 %vm743_vm1, %v1087_v24  ;;  %v1089_v25 = vpop.permute.xlu0 %1088 }
 0x163   : > { %2063 = vmatprep.mubr.msk.f32.mxu0 %vm743_vm1, %v1089_v25 }
 0x165   : > { %v1091_v26 = vpop.permute.xlu1 %1090 }
 0x166   : > { %2064 = vmatmul.mubr.msk.f32.gmra.mxu0 %vm743_vm1, %v1091_v26  ;;  %v1093_v27 = vpop.permute.xlu0 %1092 }
 0x167   : > { %2066 = vmatprep.mubr.msk.f32.mxu0 %vm743_vm1, %v1093_v27 }
 0x169   : > { %v1095_v28 = vpop.permute.xlu1 %1094 }
 0x16a   : > { %2067 = vmatmul.mubr.msk.f32.gmra.mxu0 %vm743_vm1, %v1095_v28  ;;  %v1097_v29 = vpop.permute.xlu0 %1096 }
 0x16b   : > { %2069 = vmatprep.mubr.msk.f32.mxu0 %vm743_vm1, %v1097_v29 }
 0x16d   : > { %v1099_v30 = vpop.permute.xlu1 %1098 }
 0x16e   : > { %2070 = vmatmul.mubr.msk.f32.gmra.mxu0 %vm743_vm1, %v1099_v30  ;;  %v1101_v31 = vpop.permute.xlu0 %1100 }
 0x16f   : > { %2072 = vmatprep.mubr.msk.f32.mxu0 %vm743_vm1, %v1101_v31 }
 0x171   : > { %v1103_v32 = vpop.permute.xlu1 %1102 }
 0x172   : > { %2073 = vmatmul.mubr.msk.f32.gmra.mxu0 %vm743_vm1, %v1103_v32  ;;  %v1105_v33 = vpop.permute.xlu0 %1104 }
 0x173   : > { %2075 = vmatprep.mubr.msk.f32.mxu0 %vm743_vm1, %v1105_v33  ;;  %v2642_v33 = vld [vmem:[%s2829_s7] ss:$0 sm:$0xff] }
 0x175   : > { %v1107_v34 = vpop.permute.xlu1 %1106 }
 0x176   : > { %2076 = vmatmul.mubr.msk.f32.gmra.mxu0 %vm743_vm1, %v1107_v34  ;;  %v1109_v35 = vpop.permute.xlu0 %1108  ;;  %v1434_v34 = vld [vmem:[%s2634_s19 + $0x8] sm:$0xff] }
 0x177   : > { %2078 = vmatprep.mubr.msk.f32.mxu0 %vm743_vm1, %v1109_v35 }
 0x179   : > { %v1111_v36 = vpop.permute.xlu1 %1110 }
 0x17a   : > { %2079 = vmatmul.mubr.msk.f32.gmra.mxu0 %vm743_vm1, %v1111_v36  ;;  %v1113_v37 = vpop.permute.xlu0 %1112 }
 0x17b   : > { %2081 = vmatprep.mubr.msk.f32.mxu0 %vm743_vm1, %v1113_v37 }
 0x17d   : > { %v1115_v38 = vpop.permute.xlu1 %1114 }
 0x17e   : > { %2082 = vmatmul.mubr.msk.f32.gmra.mxu0 %vm743_vm1, %v1115_v38  ;;  %v1117_v39 = vpop.permute.xlu0 %1116  ;;  %v1433_v38 = vld [vmem:[%s2634_s19] sm:$0xff] }
 0x17f   : > { %2084 = vmatprep.mubr.msk.f32.mxu0 %vm743_vm1, %v1117_v39 }
 0x181   : > { %v1119_v40 = vpop.permute.xlu1 %1118 }
 0x182   : > { %2085 = vmatmul.mubr.msk.f32.gmra.mxu0 %vm743_vm1, %v1119_v40  ;;  %v1121_v41 = vpop.permute.xlu0 %1120 }
 0x183   : > { %2087 = vmatprep.mubr.msk.f32.mxu0 %vm743_vm1, %v1121_v41 }
 0x185   : > { %v1123_v42 = vpop.permute.xlu1 %1122 }
 0x186   : > { %2088 = vmatmul.mubr.msk.f32.gmra.mxu0 %vm743_vm1, %v1123_v42  ;;  %v1125_v43 = vpop.permute.xlu0 %1124 }
 0x187   : > { %2090 = vmatprep.mubr.msk.f32.mxu0 %vm743_vm1, %v1125_v43 }
 0x189   : > { %v1127_v44 = vpop.permute.xlu1 %1126 }
 0x18a   : > { %2091 = vmatmul.mubr.msk.f32.gmra.mxu0 %vm743_vm1, %v1127_v44  ;;  %v1129_v45 = vpop.permute.xlu0 %1128 }
 0x18b   : > { %2093 = vmatprep.mubr.msk.f32.mxu0 %vm743_vm1, %v1129_v45 }
 0x18d   : > { %v1131_v46 = vpop.permute.xlu1 %1130 }
 0x18e   : > { %2094 = vmatmul.mubr.msk.f32.gmra.mxu0 %vm743_vm1, %v1131_v46  ;;  %v1133_v47 = vpop.permute.xlu0 %1132 }
 0x18f   : > { %2096 = vmatprep.mubr.msk.f32.mxu0 %vm743_vm1, %v1133_v47 }
 0x191   : > { %v1135_v48 = vpop.permute.xlu1 %1134 }
 0x192   : > { %2097 = vmatmul.mubr.msk.f32.gmra.mxu0 %vm743_vm1, %v1135_v48  ;;  %v1137_v49 = vpop.permute.xlu0 %1136 }
 0x193   : > { %2099 = vmatprep.mubr.msk.f32.mxu0 %vm743_vm1, %v1137_v49  ;;  %v1436_v49 = vld [vmem:[%s2634_s19 + $0x18] sm:$0xff] }
 0x195   : > { %v1139_v50 = vpop.permute.xlu1 %1138 }
 0x196   : > { %2100 = vmatmul.mubr.msk.f32.gmra.mxu0 %vm743_vm1, %v1139_v50  ;;  %v1141_v51 = vpop.permute.xlu0 %1140 }
 0x197   : > { %2102 = vmatprep.mubr.msk.f32.mxu0 %vm743_vm1, %v1141_v51 }
 0x199   : > { %v1143_v53 = vpop.permute.xlu1 %1142 }
 0x19a   : > { %2103 = vmatmul.mubr.msk.f32.gmra.mxu0 %vm743_vm1, %v1143_v53 }
 0x1a8   : > { %v1995_v54 = vpop.f32.mrf.mxu1 }
 0x1a9   : > { %v912_v8 = vadd.f32 %v1995_v54, %v2608_v6 }
 0x1aa   : > { %v906_v55 = vpop.f32.mrf.mxu1 }
 0x1ab   : > { %v907_v9 = vadd.f32 %v2608_v6, %v906_v55  ;;  %v1467_v11 = vmul.f32 1.442695, %v912_v8 }
 0x1ad   : > { %v1998_v56 = vpop.f32.mrf.mxu1  ;;  %v1465_v13 = vmul.f32 1.442695, %v907_v9  ;;  %2186 = vpow2.f32 %v1467_v11 }
 0x1ae   : > { %v922_v12 = vadd.f32 %v1998_v56, %v2608_v6 }
 0x1af   : > { %v916_v57 = vpop.f32.mrf.mxu1  ;;  %2188 = vpow2.f32 %v1465_v13 }
 0x1b0   : > { %v917_v14 = vadd.f32 %v2608_v6, %v916_v57  ;;  %v1471_v16 = vmul.f32 1.442695, %v922_v12 }
 0x1b1   : > { %v2001_v58 = vpop.f32.mrf.mxu1 }
 0x1b2   : > { %v932_v52 = vadd.f32 %v2001_v58, %v2608_v6  ;;  %v1469_v17 = vmul.f32 1.442695, %v917_v14  ;;  %2190 = vpow2.f32 %v1471_v16  ;;  %v1437_v16 = vld [vmem:[%s2634_s19 + $0x20] sm:$0xff] }
 0x1b3   : > { %v926_v59 = vpop.f32.mrf.mxu1 }
 0x1b4   : > { %v927_v18 = vadd.f32 %v2608_v6, %v926_v59  ;;  %v1475_v20 = vmul.f32 1.442695, %v932_v52  ;;  %2192 = vpow2.f32 %v1469_v17  ;;  %v1435_v59 = vld [vmem:[%s2634_s19 + $0x10] sm:$0xff] }
 0x1b5   : > { %v2004_v60 = vpop.f32.mrf.mxu1 }
 0x1b6   : > { %v942_v21 = vadd.f32 %v2004_v60, %v2608_v6  ;;  %v1473_v22 = vmul.f32 1.442695, %v927_v18  ;;  %2194 = vpow2.f32 %v1475_v20 }
 0x1b7   : > { %v936_v61 = vpop.f32.mrf.mxu1 }
 0x1b8   : > { %v937_v23 = vadd.f32 %v2608_v6, %v936_v61  ;;  %v1479_v25 = vmul.f32 1.442695, %v942_v21  ;;  %2196 = vpow2.f32 %v1473_v22 }
 0x1b9   : > { %v2007_v62 = vpop.f32.mrf.mxu1 }
 0x1ba   : > { %v952_v26 = vadd.f32 %v2007_v62, %v2608_v6  ;;  %v1477_v27 = vmul.f32 1.442695, %v937_v23  ;;  %2198 = vpow2.f32 %v1479_v25  ;;  %v2187_v32 = vpop.eup %2186 }
 0x1bb   : > { %v946_v63 = vpop.f32.mrf.mxu1  ;;  %v1530_v44 = vmul.f32 %v2187_v32, %v1434_v34 }
 0x1bc   : > { %v947_v28 = vadd.f32 %v2608_v6, %v946_v63  ;;  %v1483_v30 = vmul.f32 1.442695, %v952_v26  ;;  %v2189_v35 = vpop.eup %2188  ;;  %2200 = vpow2.f32 %v1477_v27 }
 0x1bd   : > { %v2010_v0 = vpop.f32.mrf.mxu1  ;;  %v1529_v48 = vmul.f32 %v2189_v35, %v1433_v38 }
 0x1be   : > { %v962_v31 = vadd.f32 %v2010_v0, %v2608_v6  ;;  %v1481_v36 = vmul.f32 1.442695, %v947_v28  ;;  %2202 = vpow2.f32 %v1483_v30 }
 0x1bf   : > { %v956_v1 = vpop.f32.mrf.mxu1  ;;  %v2191_v45 = vpop.eup %2190 }
 0x1c0   : > { %v957_v37 = vadd.f32 %v2608_v6, %v956_v1  ;;  %v1487_v42 = vmul.f32 1.442695, %v962_v31  ;;  %2204 = vpow2.f32 %v1481_v36  ;;  %v1532_v62 = vmul.f32 %v2191_v45, %v1436_v49 }
 0x1c1   : > { %v2013_v2 = vpop.f32.mrf.mxu1  ;;  %v2193_v54 = vpop.eup %2192 }
 0x1c2   : > { %v972_v39 = vadd.f32 %v2013_v2, %v2608_v6  ;;  %v1485_v50 = vmul.f32 1.442695, %v957_v37  ;;  %2206 = vpow2.f32 %v1487_v42  ;;  %v1531_v9 = vmul.f32 %v2193_v54, %v1435_v59 }
 0x1c3   : > { %v966_v3 = vpop.f32.mrf.mxu1  ;;  %v2195_v63 = vpop.eup %2194 }
 0x1c4   : > { %v967_v46 = vadd.f32 %v2608_v6, %v966_v3  ;;  %v1491_v55 = vmul.f32 1.442695, %v972_v39  ;;  %v1438_v3 = vld [vmem:[%s2634_s19 + $0x28] sm:$0xff]  ;;  %2208 = vpow2.f32 %v1485_v50 }
 0x1c5   : > { %v2601_v4 = vpop.f32.mrf.mxu1  ;;  %v2197_v11 = vpop.eup %2196  ;;  %v1534_v18 = vmul.f32 %v2195_v63, %v1438_v3  ;;  %v1443_v3 = vld [vmem:[%s2634_s19 + $0x50] sm:$0xff] }
 0x1c6   : > { %v982_v56 = vadd.f32 %v2601_v4, %v2608_v6  ;;  %v1489_v0 = vmul.f32 1.442695, %v967_v46  ;;  %2210 = vpow2.f32 %v1491_v55  ;;  %v1533_v27 = vmul.f32 %v2197_v11, %v1437_v16 }
 0x1c7   : > { %v2603_v5 = vpop.f32.mrf.mxu1  ;;  %v2199_v20 = vpop.eup %2198 }
 0x1c8   : > { %v977_v1 = vadd.f32 %v2608_v6, %v2603_v5  ;;  %v1495_v12 = vmul.f32 1.442695, %v982_v56  ;;  %2212 = vpow2.f32 %v1489_v0 }
 0x1c9   : > { %v2610_v7 = vpop.f32.mrf.mxu1  ;;  %v2201_v28 = vpop.eup %2200 }
 0x1ca   : > { %v992_v13 = vadd.f32 %v2610_v7, %v2608_v6  ;;  %v1493_v21 = vmul.f32 1.442695, %v977_v1  ;;  %v1440_v7 = vld [vmem:[%s2634_s19 + $0x38] sm:$0xff]  ;;  %2214 = vpow2.f32 %v1495_v12  ;;  %v1446_v12 = vld [vmem:[%s2634_s19 + $0x68] sm:$0xff] }
 0x1cb   : > { %v2614_v10 = vpop.f32.mrf.mxu1  ;;  %v1536_v37 = vmul.f32 %v2199_v20, %v1440_v7  ;;  %v2203_v38 = vpop.eup %2202  ;;  %v1445_v20 = vld [vmem:[%s2634_s19 + $0x60] sm:$0xff] }
 0x1cc   : > { %v987_v22 = vadd.f32 %v2608_v6, %v2614_v10  ;;  %v1499_v30 = vmul.f32 1.442695, %v992_v13  ;;  %v1439_v10 = vld [vmem:[%s2634_s19 + $0x30] sm:$0xff]  ;;  %2216 = vpow2.f32 %v1493_v21 }
 0x1cd   : > { %v2618_v15 = vpop.f32.mrf.mxu1  ;;  %v1535_v45 = vmul.f32 %v2201_v28, %v1439_v10  ;;  %v2205_v46 = vpop.eup %2204  ;;  %v1448_v28 = vld [vmem:[%s2634_s19 + $0x78] sm:$0xff] }
 0x1ce   : > { %v1002_v31 = vadd.f32 %v2618_v15, %v2608_v6  ;;  %v1497_v39 = vmul.f32 1.442695, %v987_v22  ;;  %v1442_v15 = vld [vmem:[%s2634_s19 + $0x48] sm:$0xff]  ;;  %2218 = vpow2.f32 %v1499_v30 }
 0x1cf   : > { %v2622_v19 = vpop.f32.mrf.mxu1  ;;  %v1538_v54 = vmul.f32 %v2203_v38, %v1442_v15  ;;  %v2207_v55 = vpop.eup %2206 }
 0x1d0   : > { %2220 = vpow2.f32 %v1497_v39 }
 0x1d1   : > { %v2626_v24 = vpop.f32.mrf.mxu1  ;;  %v2209_v63 = vpop.eup %2208 }
 0x1d3   : > { %v2636_v29 = vpop.f32.mrf.mxu1 }
 0x1d5   : > { %v2648_v40 = vpop.f32.mrf.mxu1 }
 0x1d7   : > { %v2662_v57 = vpop.f32.mrf.mxu1 }
 0x1d9   : > { %v2676_v14 = vpop.f32.mrf.mxu1 }
 0x1db   : > { %v2690_v32 = vpop.f32.mrf.mxu1 }
 0x1dd   : > { %v2034_v49 = vpop.f32.mrf.mxu1 }
 0x1de   : > { %v1042_v38 = vadd.f32 %v2034_v49, %v2608_v6 }
 0x1df   : > { %v1036_v1 = vpop.f32.mrf.mxu1 }
 0x1e1   : > { %v2037_v21 = vpop.f32.mrf.mxu1 }
 0x1e3   : > { %v1046_v39 = vpop.f32.mrf.mxu1 }
 0x21e   : > { %v2059_v41 = vpop.f32.mrf.mxu0 }
 0x21f   : > { %v1280_v43 = vadd.f32 %v2059_v41, %v2642_v33  ;;  %v997_v41 = vadd.f32 %v2608_v6, %v2622_v19 }
 0x220   : > { %v1274_v47 = vpop.f32.mrf.mxu0 }
 0x221   : > { %v1562_v51 = vadd.f32 %v1530_v44, %v1280_v43  ;;  %v1275_v53 = vadd.f32 %v2642_v33, %v1274_v47  ;;  %v1503_v47 = vmul.f32 1.442695, %v1002_v31  ;;  %v1501_v56 = vmul.f32 1.442695, %v997_v41 }
 0x222   : > { %v2062_v58 = vpop.f32.mrf.mxu0 }
 0x223   : > { %1594 = vst.msk [vmem:[%s2656_s24 + $0x8] sm:$0xff] %vm374_vm0, %v1562_v51  ;;  %v1561_v60 = vadd.f32 %v1529_v48, %v1275_v53  ;;  %v1290_v61 = vadd.f32 %v2062_v58, %v2642_v33  ;;  %v1012_v48 = vadd.f32 %v2626_v24, %v2608_v6  ;;  %v1441_v51 = vld [vmem:[%s2634_s19 + $0x40] sm:$0xff]  ;;  %v1007_v58 = vadd.f32 %v2608_v6, %v2636_v29 }
 0x224   : > { %v1284_v2 = vpop.f32.mrf.mxu0  ;;  %2222 = vpow2.f32 %v1503_v47  ;;  %v1022_v29 = vadd.f32 %v2648_v40, %v2608_v6 }
 0x225   : > { %1593 = vst.msk [vmem:[%s2656_s24] sm:$0xff] %vm374_vm0, %v1561_v60  ;;  %v1564_v4 = vadd.f32 %v1532_v62, %v1290_v61  ;;  %v1285_v8 = vadd.f32 %v2642_v33, %v1284_v2  ;;  %v1444_v60 = vld [vmem:[%s2634_s19 + $0x58] sm:$0xff]  ;;  %v1537_v62 = vmul.f32 %v2205_v46, %v1441_v51  ;;  %v1507_v0 = vmul.f32 1.442695, %v1012_v48 }
 0x226   : > { %v2065_v5 = vpop.f32.mrf.mxu0  ;;  %v1540_v11 = vmul.f32 %v2207_v55, %v1444_v60  ;;  %2224 = vpow2.f32 %v1501_v56  ;;  %v1505_v13 = vmul.f32 1.442695, %v1007_v58  ;;  %v1037_v46 = vadd.f32 %v2608_v6, %v1036_v1  ;;  %v2040_v55 = vpop.f32.mrf.mxu1 }
 0x227   : > { %1596 = vst.msk [vmem:[%s2656_s24 + $0x18] sm:$0xff] %vm374_vm0, %v1564_v4  ;;  %v1563_v52 = vadd.f32 %v1531_v9, %v1285_v8  ;;  %v1300_v17 = vadd.f32 %v2065_v5, %v2642_v33  ;;  %v2211_v4 = vpop.eup %2210  ;;  %2226 = vpow2.f32 %v1507_v0  ;;  %v1052_v60 = vadd.f32 %v2037_v21, %v2608_v6 }
 0x228   : > { %v1294_v23 = vpop.f32.mrf.mxu0  ;;  %v2213_v16 = vpop.eup %2212  ;;  %2228 = vpow2.f32 %v1505_v13 }
 0x229   : > { %1595 = vst.msk [vmem:[%s2656_s24 + $0x10] sm:$0xff] %vm374_vm0, %v1563_v52  ;;  %v1566_v25 = vadd.f32 %v1534_v18, %v1300_v17  ;;  %v1295_v26 = vadd.f32 %v2642_v33, %v1294_v23  ;;  %v1017_v52 = vadd.f32 %v2608_v6, %v2662_v57  ;;  %v1539_v18 = vmul.f32 %v2209_v63, %v1443_v3  ;;  %v2215_v7 = vpop.eup %2214 }
 0x22a   : > { %v2068_v34 = vpop.f32.mrf.mxu0  ;;  %v1542_v23 = vmul.f32 %v2211_v4, %v1446_v12  ;;  %v1541_v31 = vmul.f32 %v2213_v16, %v1445_v20  ;;  %v1517_v63 = vmul.f32 1.442695, %v1037_v46  ;;  %v1047_v3 = vadd.f32 %v2608_v6, %v1046_v39 }
 0x22b   : > { %1598 = vst.msk [vmem:[%s2656_s24 + $0x28] sm:$0xff] %vm374_vm0, %v1566_v25  ;;  %v1565_v35 = vadd.f32 %v1533_v27, %v1295_v26  ;;  %v1310_v36 = vadd.f32 %v2068_v34, %v2642_v33  ;;  %v1511_v25 = vmul.f32 1.442695, %v1022_v29  ;;  %v1032_v26 = vadd.f32 %v2676_v14, %v2608_v6  ;;  %v2217_v34 = vpop.eup %2216 }
 0x22c   : > { %v1304_v42 = vpop.f32.mrf.mxu0  ;;  %v1509_v10 = vmul.f32 1.442695, %v1017_v52  ;;  %v2219_v15 = vpop.eup %2218  ;;  %v1062_v16 = vadd.f32 %v2040_v55, %v2608_v6 }
 0x22d   : > { %1597 = vst.msk [vmem:[%s2656_s24 + $0x20] sm:$0xff] %vm374_vm0, %v1565_v35  ;;  %v1568_v43 = vadd.f32 %v1536_v37, %v1310_v36  ;;  %v1305_v44 = vadd.f32 %v2642_v33, %v1304_v42  ;;  %v1027_v35 = vadd.f32 %v2608_v6, %v2690_v32  ;;  %v1447_v37 = vld [vmem:[%s2634_s19 + $0x70] sm:$0xff]  ;;  %v1544_v42 = vmul.f32 %v2215_v7, %v1448_v28  ;;  %v2221_v49 = vpop.eup %2220 }
 0x22e   : > { %v2071_v50 = vpop.f32.mrf.mxu0  ;;  %2230 = vpow2.f32 %v1511_v25  ;;  %v1543_v48 = vmul.f32 %v2217_v34, %v1447_v37  ;;  %v1527_v28 = vmul.f32 1.442695, %v1062_v16 }
 0x22f   : > { %1600 = vst.msk [vmem:[%s2656_s24 + $0x38] sm:$0xff] %vm374_vm0, %v1568_v43  ;;  %v1567_v19 = vadd.f32 %v1535_v45, %v1305_v44  ;;  %v1320_v53 = vadd.f32 %v2071_v50, %v2642_v33  ;;  %v1515_v43 = vmul.f32 1.442695, %v1032_v26  ;;  %v1450_v45 = vld [vmem:[%s2634_s19 + $0x88] sm:$0xff]  ;;  %2232 = vpow2.f32 %v1509_v10  ;;  %v1453_v26 = vld [vmem:[%s2634_s19 + $0xa0] sm:$0xff] }
 0x230   : > { %v1314_v59 = vpop.f32.mrf.mxu0  ;;  %v1513_v50 = vmul.f32 1.442695, %v1027_v35  ;;  %v1546_v58 = vmul.f32 %v2219_v15, %v1450_v45  ;;  %v1456_v35 = vld [vmem:[%s2634_s19 + $0xb8] sm:$0xff]  ;;  %v1458_v45 = vld [vmem:[%s2634_s19 + $0xc8] sm:$0xff] }
 0x231   : > { %1599 = vst.msk [vmem:[%s2656_s24 + $0x30] sm:$0xff] %vm374_vm0, %v1567_v19  ;;  %v1570_v24 = vadd.f32 %v1538_v54, %v1320_v53  ;;  %v1315_v61 = vadd.f32 %v2642_v33, %v1314_v59  ;;  %v1449_v53 = vld [vmem:[%s2634_s19 + $0x80] sm:$0xff]  ;;  %v1519_v54 = vmul.f32 1.442695, %v1042_v38  ;;  %v2223_v59 = vpop.eup %2222  ;;  %2234 = vpow2.f32 %v1515_v43 }
 0x232   : > { %v2074_v2 = vpop.f32.mrf.mxu0  ;;  %v1545_v1 = vmul.f32 %v2221_v49, %v1449_v53  ;;  %2236 = vpow2.f32 %v1513_v50 }
 0x233   : > { %1602 = vst.msk [vmem:[%s2656_s24 + $0x48] sm:$0xff] %vm374_vm0, %v1570_v24  ;;  %v1569_v8 = vadd.f32 %v1537_v62, %v1315_v61  ;;  %v1330_v9 = vadd.f32 %v2074_v2, %v2642_v33  ;;  %v1452_v62 = vld [vmem:[%s2634_s19 + $0x98] sm:$0xff]  ;;  %v2225_v2 = vpop.eup %2224  ;;  %2238 = vpow2.f32 %v1519_v54 }
 0x234   : > { %v1324_v5 = vpop.f32.mrf.mxu0  ;;  %v1548_v12 = vmul.f32 %v2223_v59, %v1452_v62  ;;  %v2227_v13 = vpop.eup %2226  ;;  %2240 = vpow2.f32 %v1517_v63  ;;  %v1459_v63 = vld [vmem:[%s2634_s19 + $0xd0] sm:$0xff] }
 0x235   : > { %1601 = vst.msk [vmem:[%s2656_s24 + $0x40] sm:$0xff] %vm374_vm0, %v1569_v8  ;;  %v1572_v17 = vadd.f32 %v1540_v11, %v1330_v9  ;;  %v1325_v40 = vadd.f32 %v2642_v33, %v1324_v5  ;;  %v1451_v8 = vld [vmem:[%s2634_s19 + $0x90] sm:$0xff]  ;;  %v1056_v9 = vpop.f32.mrf.mxu1  ;;  %v1523_v5 = vmul.f32 1.442695, %v1052_v60  ;;  %v2229_v21 = vpop.eup %2228 }
 0x236   : > { %v2077_v22 = vpop.f32.mrf.mxu0  ;;  %v1547_v20 = vmul.f32 %v2225_v2, %v1451_v8  ;;  %v1549_v10 = vmul.f32 %v2229_v21, %v1453_v26  ;;  %v1463_v26 = vld [vmem:[%s2634_s19 + $0xf0] sm:$0xff] }
 0x237   : > { %1604 = vst.msk [vmem:[%s2656_s24 + $0x58] sm:$0xff] %vm374_vm0, %v1572_v17  ;;  %v1571_v57 = vadd.f32 %v1539_v18, %v1325_v40  ;;  %v1340_v27 = vadd.f32 %v2077_v22, %v2642_v33  ;;  %v1454_v40 = vld [vmem:[%s2634_s19 + $0xa8] sm:$0xff]  ;;  %v1521_v22 = vmul.f32 1.442695, %v1047_v3  ;;  %2242 = vpow2.f32 %v1523_v5  ;;  %v1461_v5 = vld [vmem:[%s2634_s19 + $0xe0] sm:$0xff] }
 0x238   : > { %v1334_v30 = vpop.f32.mrf.mxu0 }
 0x239   : > { %1603 = vst.msk [vmem:[%s2656_s24 + $0x50] sm:$0xff] %vm374_vm0, %v1571_v57  ;;  %v1574_v36 = vadd.f32 %v1542_v23, %v1340_v27  ;;  %v1335_v14 = vadd.f32 %v2642_v33, %v1334_v30  ;;  %v1057_v23 = vadd.f32 %v2608_v6, %v1056_v9  ;;  %v1550_v27 = vmul.f32 %v2227_v13, %v1454_v40 }
 0x23a   : > { %v2080_v41 = vpop.f32.mrf.mxu0  ;;  %2244 = vpow2.f32 %v1521_v22 }
 0x23b   : > { %1606 = vst.msk [vmem:[%s2656_s24 + $0x68] sm:$0xff] %vm374_vm0, %v1574_v36  ;;  %v1573_v44 = vadd.f32 %v1541_v31, %v1335_v14  ;;  %v1350_v32 = vadd.f32 %v2080_v41, %v2642_v33  ;;  %v2231_v34 = vpop.eup %2230  ;;  %v1525_v36 = vmul.f32 1.442695, %v1057_v23  ;;  %v1455_v41 = vld [vmem:[%s2634_s19 + $0xb0] sm:$0xff]  ;;  %2246 = vpow2.f32 %v1527_v28 }
 0x23c   : > { %v1344_v47 = vpop.f32.mrf.mxu0  ;;  %v2233_v38 = vpop.eup %2232  ;;  %v1552_v43 = vmul.f32 %v2231_v34, %v1456_v35 }
 0x23d   : > { %1605 = vst.msk [vmem:[%s2656_s24 + $0x60] sm:$0xff] %vm374_vm0, %v1573_v44  ;;  %v1576_v51 = vadd.f32 %v1544_v42, %v1350_v32  ;;  %v1345_v19 = vadd.f32 %v2642_v33, %v1344_v47  ;;  %2248 = vpow2.f32 %v1525_v36 }
 0x23e   : > { %v2083_v56 = vpop.f32.mrf.mxu0  ;;  %v2235_v44 = vpop.eup %2234 }
 0x23f   : > { %1608 = vst.msk [vmem:[%s2656_s24 + $0x78] sm:$0xff] %vm374_vm0, %v1576_v51  ;;  %v1575_v24 = vadd.f32 %v1543_v48, %v1345_v19  ;;  %v1360_v61 = vadd.f32 %v2083_v56, %v2642_v33  ;;  %v1551_v48 = vmul.f32 %v2233_v38, %v1455_v41  ;;  %v2237_v49 = vpop.eup %2236  ;;  %v1457_v51 = vld [vmem:[%s2634_s19 + $0xc0] sm:$0xff]  ;;  %v1554_v55 = vmul.f32 %v2235_v44, %v1458_v45 }
 0x240   : > { %v1354_v0 = vpop.f32.mrf.mxu0  ;;  %v2239_v19 = vpop.eup %2238 }
 0x241   : > { %1607 = vst.msk [vmem:[%s2656_s24 + $0x70] sm:$0xff] %vm374_vm0, %v1575_v24  ;;  %v1578_v4 = vadd.f32 %v1546_v58, %v1360_v61  ;;  %v1355_v29 = vadd.f32 %v2642_v33, %v1354_v0  ;;  %v1460_v58 = vld [vmem:[%s2634_s19 + $0xd8] sm:$0xff]  ;;  %v2241_v59 = vpop.eup %2240  ;;  %v1553_v61 = vmul.f32 %v2237_v49, %v1457_v51 }
 0x242   : > { %v2086_v11 = vpop.f32.mrf.mxu0  ;;  %v1556_v2 = vmul.f32 %v2239_v19, %v1460_v58 }
 0x243   : > { %1610 = vst.msk [vmem:[%s2656_s24 + $0x88] sm:$0xff] %vm374_vm0, %v1578_v4  ;;  %v1577_v52 = vadd.f32 %v1545_v1, %v1355_v29  ;;  %v1370_v17 = vadd.f32 %v2086_v11, %v2642_v33  ;;  %v1462_v29 = vld [vmem:[%s2634_s19 + $0xe8] sm:$0xff]  ;;  %v1555_v11 = vmul.f32 %v2241_v59, %v1459_v63 }
 0x244   : > { %v1364_v18 = vpop.f32.mrf.mxu0  ;;  %v2243_v3 = vpop.eup %2242 }
 0x245   : > { %1609 = vst.msk [vmem:[%s2656_s24 + $0x80] sm:$0xff] %vm374_vm0, %v1577_v52  ;;  %v1580_v7 = vadd.f32 %v1548_v12, %v1370_v17  ;;  %v1365_v25 = vadd.f32 %v2642_v33, %v1364_v18  ;;  %v1558_v17 = vmul.f32 %v2243_v3, %v1462_v29 }
 0x246   : > { %v2089_v57 = vpop.f32.mrf.mxu0 }
 0x247   : > { %1612 = vst.msk [vmem:[%s2656_s24 + $0x98] sm:$0xff] %vm374_vm0, %v1580_v7  ;;  %v1579_v30 = vadd.f32 %v1547_v20, %v1365_v25  ;;  %v1380_v31 = vadd.f32 %v2089_v57, %v2642_v33  ;;  %v2245_v12 = vpop.eup %2244  ;;  %v1464_v20 = vld [vmem:[%s2634_s19 + $0xf8] sm:$0xff] }
 0x248   : > { %v1374_v6 = vpop.f32.mrf.mxu0  ;;  %v2247_v40 = vpop.eup %2246  ;;  %v1557_v23 = vmul.f32 %v2245_v12, %v1461_v5 }
 0x249   : > { %1611 = vst.msk [vmem:[%s2656_s24 + $0x90] sm:$0xff] %vm374_vm0, %v1579_v30  ;;  %v1582_v14 = vadd.f32 %v1550_v27, %v1380_v31  ;;  %v1375_v37 = vadd.f32 %v2642_v33, %v1374_v6  ;;  %v1560_v28 = vmul.f32 %v2247_v40, %v1464_v20 }
 0x24a   : > { %v2092_v39 = vpop.f32.mrf.mxu0  ;;  %v2249_v7 = vpop.eup %2248 }
 0x24b   : > { %1614 = vst.msk [vmem:[%s2656_s24 + $0xa8] sm:$0xff] %vm374_vm0, %v1582_v14  ;;  %v1581_v42 = vadd.f32 %v1549_v10, %v1375_v37  ;;  %v1390_v15 = vadd.f32 %v2092_v39, %v2642_v33  ;;  %v1559_v6 = vmul.f32 %v2249_v7, %v1463_v26 }
 0x24c   : > { %v1384_v32 = vpop.f32.mrf.mxu0 }
 0x24d   : > { %1613 = vst.msk [vmem:[%s2656_s24 + $0xa0] sm:$0xff] %vm374_vm0, %v1581_v42  ;;  %v1584_v46 = vadd.f32 %v1552_v43, %v1390_v15  ;;  %v1385_v47 = vadd.f32 %v2642_v33, %v1384_v32 }
 0x24e   : > { %v2095_v50 = vpop.f32.mrf.mxu0 }
 0x24f   : > { %1616 = vst.msk [vmem:[%s2656_s24 + $0xb8] sm:$0xff] %vm374_vm0, %v1584_v46  ;;  %v1583_v53 = vadd.f32 %v1551_v48, %v1385_v47  ;;  %v1400_v54 = vadd.f32 %v2095_v50, %v2642_v33 }
 0x250   : > { %v1394_v56 = vpop.f32.mrf.mxu0 }
 0x251   : > { %1615 = vst.msk [vmem:[%s2656_s24 + $0xb0] sm:$0xff] %vm374_vm0, %v1583_v53  ;;  %v1586_v60 = vadd.f32 %v1554_v55, %v1400_v54  ;;  %v1395_v24 = vadd.f32 %v2642_v33, %v1394_v56 }
 0x252   : > { %v2098_v62 = vpop.f32.mrf.mxu0 }
 0x253   : > { %1618 = vst.msk [vmem:[%s2656_s24 + $0xc8] sm:$0xff] %vm374_vm0, %v1586_v60  ;;  %v1585_v0 = vadd.f32 %v1553_v61, %v1395_v24  ;;  %v1410_v1 = vadd.f32 %v2098_v62, %v2642_v33 }
 0x254   : > { %v1404_v4 = vpop.f32.mrf.mxu0 }
 0x255   : > { %1617 = vst.msk [vmem:[%s2656_s24 + $0xc0] sm:$0xff] %vm374_vm0, %v1585_v0  ;;  %v1588_v8 = vadd.f32 %v1556_v2, %v1410_v1  ;;  %v1405_v9 = vadd.f32 %v2642_v33, %v1404_v4 }
 0x256   : > { %v2101_v13 = vpop.f32.mrf.mxu0 }
 0x257   : > { %1620 = vst.msk [vmem:[%s2656_s24 + $0xd8] sm:$0xff] %vm374_vm0, %v1588_v8  ;;  %v1587_v16 = vadd.f32 %v1555_v11, %v1405_v9  ;;  %v1420_v52 = vadd.f32 %v2101_v13, %v2642_v33 }
 0x258   : > { %v1414_v18 = vpop.f32.mrf.mxu0 }
 0x259   : > { %1619 = vst.msk [vmem:[%s2656_s24 + $0xd0] sm:$0xff] %vm374_vm0, %v1587_v16  ;;  %v1590_v21 = vadd.f32 %v1558_v17, %v1420_v52  ;;  %v1415_v22 = vadd.f32 %v2642_v33, %v1414_v18 }
 0x25a   : > { %v2104_v25 = vpop.f32.mrf.mxu0 }
 0x25b   : > { %1622 = vst.msk [vmem:[%s2656_s24 + $0xe8] sm:$0xff] %vm374_vm0, %v1590_v21  ;;  %v1589_v57 = vadd.f32 %v1557_v23, %v1415_v22  ;;  %v1430_v27 = vadd.f32 %v2104_v25, %v2642_v33 }
 0x25c   : > { %v1424_v30 = vpop.f32.mrf.mxu0 }
 0x25d   : > { %1621 = vst.msk [vmem:[%s2656_s24 + $0xe0] sm:$0xff] %vm374_vm0, %v1589_v57  ;;  %v1592_v31 = vadd.f32 %v1560_v28, %v1430_v27  ;;  %v1425_v34 = vadd.f32 %v2642_v33, %v1424_v30 }
 0x25f   : > { %1624 = vst.msk [vmem:[%s2656_s24 + $0xf8] sm:$0xff] %vm374_vm0, %v1592_v31  ;;  %v1591_v10 = vadd.f32 %v1559_v6, %v1425_v34 }
 0x261   : > { %1623 = vst.msk [vmem:[%s2656_s24 + $0xf0] sm:$0xff] %vm374_vm0, %v1591_v10 }
 0x262 PF: > { %s18_s27 = sadd.s32 1, %s2256_s27  }
 0x263   : > { %p15_p4 = scmp.ge.s32.totalorder %s18_s27, 4  }
 0x265   :  { %17 = sbr.rel (!%p15_p4) target bundleno = 1 (0x1), region = 85 }

</bundles_post_ra>
